<compile_context>
chip_gen: v5e
topology: v5e:2x2
jax: 0.10.0
libtpu: 0.0.40
codegen_flags: <defaults>
</compile_context>

<pallas_src>
import functools

import jax
import jax.numpy as jnp
from jax.experimental import pallas as pl
from jax.experimental.pallas import tpu as pltpu

IN_DIM = 28 * 28          # 784
H1, H2, OUT_DIM = 100, 50, 10
H1P, H2P, OUTP = 128, 128, 128   # lane-padded feature dims
DEFAULT_TB = 512                 # batch tile (sweet spot per HBM-roofline sweep)


def _round_up(n, m):
    return ((n + m - 1) // m) * m


def mlp_kernel(x_ref, w1_ref, b1_ref, w2_ref, b2_ref, w3_ref, b3_ref, o_ref):
    # x: (TB, 784) bf16; weights bf16; biases f32. MXU accumulates in f32.
    x = x_ref[...]

    # Layer 1: Linear(784 -> 128pad) + ReLU
    h1 = jnp.dot(x, w1_ref[...], preferred_element_type=jnp.float32) + b1_ref[...]
    h1 = jnp.maximum(h1, 0.0).astype(jnp.bfloat16)

    # Layer 2: Linear(128pad -> 128pad) + ReLU  (padded lanes are exactly zero)
    h2 = jnp.dot(h1, w2_ref[...], preferred_element_type=jnp.float32) + b2_ref[...]
    h2 = jnp.maximum(h2, 0.0).astype(jnp.bfloat16)

    # Layer 3: Linear(128pad -> 128pad) + Sigmoid; lane-dense (TB, 128) f32 store.
    logits = jnp.dot(h2, w3_ref[...], preferred_element_type=jnp.float32) + b3_ref[...]
    o_ref[...] = jax.nn.sigmoid(logits)


def prepare_params(params):
    """Zero-pad feature dims to lane multiples and cast weights to bf16 (biases stay f32)."""
    w1, b1, w2, b2, w3, b3 = params

    def pad2(a, rows, cols):
        return jnp.pad(a, ((0, rows - a.shape[0]), (0, cols - a.shape[1])))

    w1p = pad2(w1, IN_DIM, H1P).astype(jnp.bfloat16)
    b1p = pad2(b1, 1, H1P).astype(jnp.float32)
    w2p = pad2(w2, H1P, H2P).astype(jnp.bfloat16)
    b2p = pad2(b2, 1, H2P).astype(jnp.float32)
    w3p = pad2(w3, H2P, OUTP).astype(jnp.bfloat16)
    b3p = pad2(b3, 1, OUTP).astype(jnp.float32)
    return (w1p, b1p, w2p, b2p, w3p, b3p)


@functools.partial(jax.jit, static_argnames=("tb",))
def mlp_forward(x, params, *, tb=DEFAULT_TB):
    B = x.shape[0]
    w1, b1, w2, b2, w3, b3 = prepare_params(params)

    # Batch tiling: pick a tile that is a multiple of 8 and pad B up to a tile multiple.
    tb_eff = min(tb, _round_up(B, 8))
    b_pad = _round_up(B, tb_eff)

    xb = x.astype(jnp.bfloat16)
    if b_pad != B:
        xb = jnp.pad(xb, ((0, b_pad - B), (0, 0)))

    grid = (b_pad // tb_eff,)
    const2 = lambda i: (0, 0)

    flops = 2 * b_pad * (IN_DIM * H1P + H1P * H2P + H2P * OUTP)
    bytes_accessed = (
        b_pad * IN_DIM * 2                                   # x (bf16)
        + (IN_DIM * H1P + H1P * H2P + H2P * OUTP) * 2        # weights (bf16)
        + (H1P + H2P + OUTP) * 4                             # biases (f32)
        + b_pad * OUTP * 4                                   # output (f32)
    )

    out = pl.pallas_call(
        mlp_kernel,
        out_shape=jax.ShapeDtypeStruct((b_pad, OUTP), jnp.float32),
        grid=grid,
        in_specs=[
            pl.BlockSpec((tb_eff, IN_DIM), lambda i: (i, 0)),   # activations: tiled on batch
            pl.BlockSpec((IN_DIM, H1P), const2),                # weights/biases: VMEM-resident
            pl.BlockSpec((1, H1P), const2),
            pl.BlockSpec((H1P, H2P), const2),
            pl.BlockSpec((1, H2P), const2),
            pl.BlockSpec((H2P, OUTP), const2),
            pl.BlockSpec((1, OUTP), const2),
        ],
        out_specs=pl.BlockSpec((tb_eff, OUTP), lambda i: (i, 0)),
        compiler_params=pltpu.CompilerParams(
            dimension_semantics=("parallel",),       # megacore-shard batch steps on v7x
            vmem_limit_bytes=32 * 1024 * 1024,       # fits easily; safe on v7x's 64 MiB VMEM
        ),
        cost_estimate=pl.CostEstimate(
            flops=flops,
            transcendentals=b_pad * OUTP,
            bytes_accessed=bytes_accessed,
        ),
    )(xb, w1, b1, w2, b2, w3, b3)

    # Drop batch padding and the lane padding of the 10-wide output.
    return out[:B, :OUT_DIM]


def init_params(key):
    """Deterministic init mirroring PyTorch nn.Linear default U(-1/sqrt(fan_in), 1/sqrt(fan_in)).
    Weights stored as (in_features, out_features) so the kernel computes x @ W + b."""
    def linear(key, fan_in, fan_out):
        kw, kb = jax.random.split(key)
        bound = 1.0 / jnp.sqrt(fan_in)
        w = jax.random.uniform(kw, (fan_in, fan_out), jnp.float32, -bound, bound)
        b = jax.random.uniform(kb, (1, fan_out), jnp.float32, -bound, bound)
        return w, b

    k1, k2, k3 = jax.random.split(key, 3)
    w1, b1 = linear(k1, IN_DIM, H1)
    w2, b2 = linear(k2, H1, H2)
    w3, b3 = linear(k3, H2, OUT_DIM)
    return (w1, b1, w2, b2, w3, b3)


def reference_forward(x, params):
    w1, b1, w2, b2, w3, b3 = params
    h1 = jnp.maximum(x @ w1 + b1, 0.0)
    h2 = jnp.maximum(h1 @ w2 + b2, 0.0)
    return jax.nn.sigmoid(h2 @ w3 + b3)


if __name__ == "__main__":
    key = jax.random.PRNGKey(0)
    kx, kp = jax.random.split(key)
    params = init_params(kp)

    # Small batch (exercises the B < TB path).
    B = 8
    x = jax.random.normal(kx, (B, IN_DIM), jnp.float32)
    out = jax.block_until_ready(mlp_forward(x, params))
    ref = reference_forward(x, params)
    assert out.shape == (B, OUT_DIM)
    # bf16 dot inputs vs f32 reference: sigmoid outputs agree to ~1e-2.
    assert jnp.allclose(out, ref, atol=2e-2, rtol=2e-2)

    # Larger, non-tile-multiple batch (exercises batch tiling + padding path).
    B2 = 1040
    x2 = jax.random.normal(kx, (B2, IN_DIM), jnp.float32)
    out2 = jax.block_until_ready(mlp_forward(x2, params))
    ref2 = reference_forward(x2, params)
    assert out2.shape == (B2, OUT_DIM)
    assert jnp.allclose(out2, ref2, atol=2e-2, rtol=2e-2)

    print("KERNEL_OK")
</pallas_src>

<mosaic_0001>
module attributes {stable_mosaic.version = 11 : i64} {
  func.func @mlp_kernel(%arg0: i32, %arg1: memref<8x784xbf16, #tpu.memory_space<vmem>>, %arg2: memref<784x128xbf16, #tpu.memory_space<vmem>>, %arg3: memref<1x128xf32, #tpu.memory_space<vmem>>, %arg4: memref<128x128xbf16, #tpu.memory_space<vmem>>, %arg5: memref<1x128xf32, #tpu.memory_space<vmem>>, %arg6: memref<128x128xbf16, #tpu.memory_space<vmem>>, %arg7: memref<1x128xf32, #tpu.memory_space<vmem>>, %arg8: memref<8x128xf32, #tpu.memory_space<vmem>>) attributes {dimension_semantics = [#tpu.dimension_semantics<parallel>], iteration_bounds = array<i64: 1>, scalar_prefetch = 0 : i64, scratch_operands = 0 : i64, tpu.core_type = #tpu.core_type<tc>, window_params = [{transform_indices = @transform_0, window_bounds = array<i64: 8, 784>}, {pipeline_mode = #tpu.pipeline_mode<synchronous>, transform_indices = @transform_1, window_bounds = array<i64: 784, 128>}, {pipeline_mode = #tpu.pipeline_mode<synchronous>, transform_indices = @transform_2, window_bounds = array<i64: 1, 128>}, {pipeline_mode = #tpu.pipeline_mode<synchronous>, transform_indices = @transform_3, window_bounds = array<i64: 128, 128>}, {pipeline_mode = #tpu.pipeline_mode<synchronous>, transform_indices = @transform_4, window_bounds = array<i64: 1, 128>}, {pipeline_mode = #tpu.pipeline_mode<synchronous>, transform_indices = @transform_5, window_bounds = array<i64: 128, 128>}, {pipeline_mode = #tpu.pipeline_mode<synchronous>, transform_indices = @transform_6, window_bounds = array<i64: 1, 128>}, {transform_indices = @transform_7, window_bounds = array<i64: 8, 128>}]} {
    %c0 = arith.constant 0 : index
    %c0_0 = arith.constant 0 : index
    %0 = vector.load %arg1[%c0, %c0_0] : memref<8x784xbf16, #tpu.memory_space<vmem>>, vector<8x784xbf16>
    %c0_1 = arith.constant 0 : index
    %c0_2 = arith.constant 0 : index
    %1 = vector.load %arg2[%c0_1, %c0_2] : memref<784x128xbf16, #tpu.memory_space<vmem>>, vector<784x128xbf16>
    %cst = arith.constant dense<0.000000e+00> : vector<8x128xf32>
    %2 = tpu.matmul %0, %1, %cst {dimension_numbers = #tpu.dot_dimension_numbers<[1], [0], [0], [1], [0, 0, 1, 1], [], []>} : vector<8x784xbf16>, vector<784x128xbf16>, vector<8x128xf32> -> vector<8x128xf32>
    %c0_3 = arith.constant 0 : index
    %c0_4 = arith.constant 0 : index
    %3 = vector.load %arg3[%c0_3, %c0_4] : memref<1x128xf32, #tpu.memory_space<vmem>>, vector<1x128xf32>
    %4 = vector.broadcast %3 : vector<1x128xf32> to vector<8x128xf32>
    %5 = arith.addf %2, %4 : vector<8x128xf32>
    %cst_5 = arith.constant 0.000000e+00 : f32
    %6 = vector.broadcast %cst_5 : f32 to vector<8x128xf32>
    %7 = arith.maximumf %5, %6 : vector<8x128xf32>
    %8 = arith.truncf %7 : vector<8x128xf32> to vector<8x128xbf16>
    %c0_6 = arith.constant 0 : index
    %c0_7 = arith.constant 0 : index
    %9 = vector.load %arg4[%c0_6, %c0_7] : memref<128x128xbf16, #tpu.memory_space<vmem>>, vector<128x128xbf16>
    %cst_8 = arith.constant dense<0.000000e+00> : vector<8x128xf32>
    %10 = tpu.matmul %8, %9, %cst_8 {dimension_numbers = #tpu.dot_dimension_numbers<[1], [0], [0], [1], [0, 0, 1, 1], [], []>} : vector<8x128xbf16>, vector<128x128xbf16>, vector<8x128xf32> -> vector<8x128xf32>
    %c0_9 = arith.constant 0 : index
    %c0_10 = arith.constant 0 : index
    %11 = vector.load %arg5[%c0_9, %c0_10] : memref<1x128xf32, #tpu.memory_space<vmem>>, vector<1x128xf32>
    %12 = vector.broadcast %11 : vector<1x128xf32> to vector<8x128xf32>
    %13 = arith.addf %10, %12 : vector<8x128xf32>
    %cst_11 = arith.constant 0.000000e+00 : f32
    %14 = vector.broadcast %cst_11 : f32 to vector<8x128xf32>
    %15 = arith.maximumf %13, %14 : vector<8x128xf32>
    %16 = arith.truncf %15 : vector<8x128xf32> to vector<8x128xbf16>
    %c0_12 = arith.constant 0 : index
    %c0_13 = arith.constant 0 : index
    %17 = vector.load %arg6[%c0_12, %c0_13] : memref<128x128xbf16, #tpu.memory_space<vmem>>, vector<128x128xbf16>
    %cst_14 = arith.constant dense<0.000000e+00> : vector<8x128xf32>
    %18 = tpu.matmul %16, %17, %cst_14 {dimension_numbers = #tpu.dot_dimension_numbers<[1], [0], [0], [1], [0, 0, 1, 1], [], []>} : vector<8x128xbf16>, vector<128x128xbf16>, vector<8x128xf32> -> vector<8x128xf32>
    %c0_15 = arith.constant 0 : index
    %c0_16 = arith.constant 0 : index
    %19 = vector.load %arg7[%c0_15, %c0_16] : memref<1x128xf32, #tpu.memory_space<vmem>>, vector<1x128xf32>
    %20 = vector.broadcast %19 : vector<1x128xf32> to vector<8x128xf32>
    %21 = arith.addf %18, %20 : vector<8x128xf32>
    %22 = arith.negf %21 : vector<8x128xf32>
    %23 = math.exp %22 : vector<8x128xf32>
    %cst_17 = arith.constant 1.000000e+00 : f32
    %24 = vector.broadcast %cst_17 : f32 to vector<8x128xf32>
    %25 = arith.addf %24, %23 : vector<8x128xf32>
    %26 = arith.divf %24, %25 : vector<8x128xf32>
    %c0_18 = arith.constant 0 : index
    %c0_19 = arith.constant 0 : index
    %27 = vector.load %arg8[%c0_18, %c0_19] : memref<8x128xf32, #tpu.memory_space<vmem>>, vector<8x128xf32>
    tpu.vector_store %arg8[%c0_18, %c0_19], %26 {strides = array<i32>} : memref<8x128xf32, #tpu.memory_space<vmem>>, vector<8x128xf32>,
    return
  }
  func.func @transform_0(%arg0: i32) -> (i32, i32) {
    %c0_i32 = arith.constant 0 : i32
    %c0_i32_0 = arith.constant 0 : i32
    return %arg0, %c0_i32 : i32, i32
  }
  func.func @transform_1(%arg0: i32) -> (i32, i32) {
    %c0_i32 = arith.constant 0 : i32
    %c0_i32_0 = arith.constant 0 : i32
    %c0_i32_1 = arith.constant 0 : i32
    return %c0_i32, %c0_i32_0 : i32, i32
  }
  func.func @transform_2(%arg0: i32) -> (i32, i32) {
    %c0_i32 = arith.constant 0 : i32
    %c0_i32_0 = arith.constant 0 : i32
    %c0_i32_1 = arith.constant 0 : i32
    return %c0_i32, %c0_i32_0 : i32, i32
  }
  func.func @transform_3(%arg0: i32) -> (i32, i32) {
    %c0_i32 = arith.constant 0 : i32
    %c0_i32_0 = arith.constant 0 : i32
    %c0_i32_1 = arith.constant 0 : i32
    return %c0_i32, %c0_i32_0 : i32, i32
  }
  func.func @transform_4(%arg0: i32) -> (i32, i32) {
    %c0_i32 = arith.constant 0 : i32
    %c0_i32_0 = arith.constant 0 : i32
    %c0_i32_1 = arith.constant 0 : i32
    return %c0_i32, %c0_i32_0 : i32, i32
  }
  func.func @transform_5(%arg0: i32) -> (i32, i32) {
    %c0_i32 = arith.constant 0 : i32
    %c0_i32_0 = arith.constant 0 : i32
    %c0_i32_1 = arith.constant 0 : i32
    return %c0_i32, %c0_i32_0 : i32, i32
  }
  func.func @transform_6(%arg0: i32) -> (i32, i32) {
    %c0_i32 = arith.constant 0 : i32
    %c0_i32_0 = arith.constant 0 : i32
    %c0_i32_1 = arith.constant 0 : i32
    return %c0_i32, %c0_i32_0 : i32, i32
  }
  func.func @transform_7(%arg0: i32) -> (i32, i32) {
    %c0_i32 = arith.constant 0 : i32
    %c0_i32_0 = arith.constant 0 : i32
    return %arg0, %c0_i32 : i32, i32
  }
}

</mosaic_0001>

<bundles_post_ra>
// kernel: mlp_forward.1
= control target key start
LH: loop header
LB: loop body
LE: loop exit
PB: predicated region body
PF: predicated region fallthrough
CT: control target
= control target key end

     0   :  { %s1370_s0 = inlined_call_operand.vmem [shape: bf16[8,784], index: 0, kind: input, shape index: {}]   ;;  %s1371_s1 = inlined_call_operand.vmem [shape: bf16[784,128], index: 1, kind: input, shape index: {}]   ;;  %s1372_s2 = inlined_call_operand.vmem [shape: f32[1,128], index: 2, kind: input, shape index: {}]   ;;  %s1373_s3 = inlined_call_operand.vmem [shape: bf16[128,128], index: 3, kind: input, shape index: {}]   ;;  %s1374_s4 = inlined_call_operand.vmem [shape: f32[1,128], index: 4, kind: input, shape index: {}]   ;;  %s1375_s5 = inlined_call_operand.vmem [shape: bf16[128,128], index: 5, kind: input, shape index: {}]   ;;  %s1376_s6 = inlined_call_operand.vmem [shape: f32[1,128], index: 6, kind: input, shape index: {}]   ;;  %s1377_s7 = inlined_call_operand.hbm [shape: f32[8,128], index: 7, kind: output, shape index: {}]  }
   0x1   :  { %v1018_v0 = vld [vmem:[%s1371_s1 + $0x38] sm:$0xff]  ;;  %v1017_v3 = vld [vmem:[%s1371_s1 + $0x30] sm:$0xff]  ;;  %v1016_v8 = vld [vmem:[%s1371_s1 + $0x28] sm:$0xff] }
   0x2   :  { %v1026_v1 = vld [vmem:[%s1371_s1 + $0x78] sm:$0xff]  ;;  %456 = vmatpush.bf16.msra.mxu0 %v1018_v0  ;;  %v1025_v4 = vld [vmem:[%s1371_s1 + $0x70] sm:$0xff]  ;;  %v1024_v9 = vld [vmem:[%s1371_s1 + $0x68] sm:$0xff] }
   0x3   :  { %v1034_v2 = vld [vmem:[%s1371_s1 + $0xb8] sm:$0xff]  ;;  %469 = vmatpush.bf16.msra.mxu1 %v1026_v1  ;;  %v1033_v5 = vld [vmem:[%s1371_s1 + $0xb0] sm:$0xff]  ;;  %v1032_v10 = vld [vmem:[%s1371_s1 + $0xa8] sm:$0xff] }
   0x4   :  { %482 = vmatpush.bf16.msra.mxu2 %v1034_v2  ;;  %v1042_v6 = vld [vmem:[%s1371_s1 + $0xf8] sm:$0xff]  ;;  %v1041_v7 = vld [vmem:[%s1371_s1 + $0xf0] sm:$0xff]  ;;  %v1040_v11 = vld [vmem:[%s1371_s1 + $0xe8] sm:$0xff] }
   0x5   :  { %495 = vmatpush.bf16.msra.mxu3 %v1042_v6  ;;  %v1015_v12 = vld [vmem:[%s1371_s1 + $0x20] sm:$0xff]  ;;  %v1014_v16 = vld [vmem:[%s1371_s1 + $0x18] sm:$0xff] }
   0x6   :  { %457 = vmatpush.bf16.msra.mxu0 %v1017_v3  ;;  %v1023_v13 = vld [vmem:[%s1371_s1 + $0x60] sm:$0xff]  ;;  %v1022_v17 = vld [vmem:[%s1371_s1 + $0x58] sm:$0xff] }
   0x7   :  { %470 = vmatpush.bf16.msra.mxu1 %v1025_v4  ;;  %v1031_v14 = vld [vmem:[%s1371_s1 + $0xa0] sm:$0xff]  ;;  %v1030_v18 = vld [vmem:[%s1371_s1 + $0x98] sm:$0xff] }
   0x8   :  { %483 = vmatpush.bf16.msra.mxu2 %v1033_v5  ;;  %v1039_v15 = vld [vmem:[%s1371_s1 + $0xe0] sm:$0xff] }
   0x9   :  { %496 = vmatpush.bf16.msra.mxu3 %v1041_v7 }
   0xa   :  { %458 = vmatpush.bf16.msra.mxu0 %v1016_v8 }
   0xb   :  { %471 = vmatpush.bf16.msra.mxu1 %v1024_v9 }
   0xc   :  { %484 = vmatpush.bf16.msra.mxu2 %v1032_v10 }
   0xd   :  { %497 = vmatpush.bf16.msra.mxu3 %v1040_v11 }
   0xe   :  { %459 = vmatpush.bf16.msra.mxu0 %v1015_v12 }
   0xf   :  { %472 = vmatpush.bf16.msra.mxu1 %v1023_v13 }
  0x10   :  { %485 = vmatpush.bf16.msra.mxu2 %v1031_v14 }
  0x11   :  { %12 = vsyncpa [#allocation3], 0  ;;  %498 = vmatpush.bf16.msra.mxu3 %v1039_v15  ;;  %v1038_v19 = vld [vmem:[%s1371_s1 + $0xd8] sm:$0xff]  ;;  %v1013_v20 = vld [vmem:[%s1371_s1 + $0x10] sm:$0xff]  ;;  %vm452_vm0 = vcmask 130048  }
  0x12   :  { %460 = vmatpush.bf16.msra.mxu0 %v1014_v16  ;;  %v1021_v21 = vld [vmem:[%s1371_s1 + $0x50] sm:$0xff]  ;;  %v1012_v24 = vld [vmem:[%s1371_s1 + $0x8] sm:$0xff]  ;;  %v28_v26 = vld [vmem:[%s1370_s0] sm:$0xff] }
  0x13   :  { %473 = vmatpush.bf16.msra.mxu1 %v1022_v17  ;;  %v1029_v22 = vld [vmem:[%s1371_s1 + $0x90] sm:$0xff]  ;;  %v1020_v25 = vld [vmem:[%s1371_s1 + $0x48] sm:$0xff]  ;;  %v138_v29 = vunpack.c.l.b16 %v28_v26  ;;  %v139_v31 = vunpack.c.h.b16 %v28_v26  ;;  %v1011_v32 = vld [vmem:[%s1371_s1] sm:$0xff] }
  0x14   :  { %486 = vmatpush.bf16.msra.mxu2 %v1030_v18  ;;  %v1037_v23 = vld [vmem:[%s1371_s1 + $0xd0] sm:$0xff]  ;;  %v1028_v27 = vld [vmem:[%s1371_s1 + $0x88] sm:$0xff]  ;;  %v1019_v33 = vld [vmem:[%s1371_s1 + $0x40] sm:$0xff] }
  0x15   :  { %499 = vmatpush.bf16.msra.mxu3 %v1038_v19  ;;  %v29_v28 = vld [vmem:[%s1370_s0 + $0x8] sm:$0xff]  ;;  %v1050_v34 = vld [vmem:[%s1371_s1 + $0x138] sm:$0xff]  ;;  %v1027_v36 = vld [vmem:[%s1371_s1 + $0x80] sm:$0xff]  ;;  %v145_v38 = vpack.c.b16 %v138_v29, %v138_v29  ;;  %v146_v39 = vpack.c.b16 %v139_v31, %v139_v31 }
  0x16   :  { %461 = vmatpush.bf16.msra.mxu0 %v1013_v20  ;;  %v1036_v30 = vld [vmem:[%s1371_s1 + $0xc8] sm:$0xff]  ;;  %v1058_v35 = vld [vmem:[%s1371_s1 + $0x178] sm:$0xff]  ;;  %v140_v37 = vunpack.c.l.b16 %v29_v28  ;;  %v141_v40 = vunpack.c.h.b16 %v29_v28  ;;  %v1035_v41 = vld [vmem:[%s1371_s1 + $0xc0] sm:$0xff] }
  0x17   :  { %474 = vmatpush.bf16.msra.mxu1 %v1021_v21  ;;  %v1059_v42 = vld [vmem:[%s1371_s1 + $0x180] sm:$0xff]  ;;  %v1049_v43 = vld [vmem:[%s1371_s1 + $0x130] sm:$0xff]  ;;  %v1048_v47 = vld [vmem:[%s1371_s1 + $0x128] sm:$0xff] }
  0x18   :  { %487 = vmatpush.bf16.msra.mxu2 %v1029_v22  ;;  %v1057_v44 = vld [vmem:[%s1371_s1 + $0x170] sm:$0xff]  ;;  %v147_v45 = vpack.c.b16 %v140_v37, %v140_v37  ;;  %v148_v46 = vpack.c.b16 %v141_v40, %v141_v40  ;;  %v1056_v48 = vld [vmem:[%s1371_s1 + $0x168] sm:$0xff]  ;;  %v1047_v49 = vld [vmem:[%s1371_s1 + $0x120] sm:$0xff] }
  0x19   :  { %500 = vmatpush.bf16.msra.mxu3 %v1037_v23  ;;  %v1055_v50 = vld [vmem:[%s1371_s1 + $0x160] sm:$0xff]  ;;  %v31_v51 = vld [vmem:[%s1370_s0 + $0x18] sm:$0xf]  ;;  %v1045_v55 = vld [vmem:[%s1371_s1 + $0x110] sm:$0xff] }
  0x1a   :  { %462 = vmatpush.bf16.msra.mxu0 %v1012_v24  ;;  %v1046_v52 = vld [vmem:[%s1371_s1 + $0x118] sm:$0xff]  ;;  %v144_v54 = vunpack.c.l.b16 %v31_v51  ;;  %v1053_v56 = vld [vmem:[%s1371_s1 + $0x150] sm:$0xff]  ;;  %v1044_v58 = vld [vmem:[%s1371_s1 + $0x108] sm:$0xff] }
  0x1b   :  { %475 = vmatpush.bf16.msra.mxu1 %v1020_v25  ;;  %v1054_v53 = vld [vmem:[%s1371_s1 + $0x158] sm:$0xff]  ;;  %v1052_v59 = vld [vmem:[%s1371_s1 + $0x148] sm:$0xff]  ;;  %v30_v60 = vld [vmem:[%s1370_s0 + $0x10] sm:$0xff] }
  0x1c   :  { %488 = vmatpush.bf16.msra.mxu2 %v1028_v27  ;;  %v151_v57 = vpack.c.b16 %v144_v54, %v144_v54  ;;  %v142_v61 = vunpack.c.l.b16 %v30_v60  ;;  %v143_v62 = vunpack.c.h.b16 %v30_v60  ;;  %v1043_v63 = vld [vmem:[%s1371_s1 + $0x100] sm:$0xff]  ;;  %v1067_v3 = vld [vmem:[%s1373_s3 + $0x38] sm:$0xff]  ;;  %v1066_v4 = vld [vmem:[%s1373_s3 + $0x30] sm:$0xff] }
  0x1d   :  { %501 = vmatpush.bf16.msra.mxu3 %v1036_v30  ;;  %v1051_v0 = vld [vmem:[%s1371_s1 + $0x140] sm:$0xff]  ;;  %v1065_v5 = vld [vmem:[%s1373_s3 + $0x28] sm:$0xff]  ;;  %v1063_v7 = vld [vmem:[%s1373_s3 + $0x18] sm:$0xff] }
  0x1e   :  { %463 = vmatpush.bf16.msra.mxu0 %v1011_v32  ;;  %v149_v1 = vpack.c.b16 %v142_v61, %v142_v61  ;;  %v150_v2 = vpack.c.b16 %v143_v62, %v143_v62  ;;  %v1064_v6 = vld [vmem:[%s1373_s3 + $0x20] sm:$0xff]  ;;  %v1062_v8 = vld [vmem:[%s1373_s3 + $0x10] sm:$0xff]  ;;  %v1061_v9 = vld [vmem:[%s1373_s3 + $0x8] sm:$0xff] }
  0x1f   :  { %476 = vmatpush.bf16.msra.mxu1 %v1019_v33  ;;  %v1060_v12 = vld [vmem:[%s1373_s3] sm:$0xff]  ;;  %v1075_v15 = vld [vmem:[%s1375_s5 + $0x38] sm:$0xff]  ;;  %v1074_v18 = vld [vmem:[%s1375_s5 + $0x30] sm:$0xff] }
  0x20   :  { %489 = vmatpush.bf16.msra.mxu2 %v1027_v36  ;;  %v1077_v19 = vld [vmem:[%s1372_s2] ss:$0 sm:$0xff]  ;;  %v1073_v20 = vld [vmem:[%s1375_s5 + $0x28] sm:$0xff]  ;;  %v1071_v26 = vld [vmem:[%s1375_s5 + $0x18] sm:$0xff] }
  0x21   :  { %464 = vmatmul.bf16.vlgmr.msra.gmra.mxu0 %v145_v38  ;;  %502 = vmatpush.bf16.msra.mxu3 %v1035_v41  ;;  %v1072_v24 = vld [vmem:[%s1375_s5 + $0x20] sm:$0xff]  ;;  %v1070_v29 = vld [vmem:[%s1375_s5 + $0x10] sm:$0xff]  ;;  %v1069_v41 = vld [vmem:[%s1375_s5 + $0x8] sm:$0xff] }
  0x22   :  { %508 = vmatpush.bf16.msrb.mxu0 %v1050_v34  ;;  %477 = vmatmul.bf16.vlgmr.msra.gmra.mxu1 %v146_v39 }
  0x23   :  { %521 = vmatpush.bf16.msrb.mxu1 %v1058_v35  ;;  %490 = vmatmul.bf16.vlgmr.msra.gmra.mxu2 %v147_v45 }
  0x24   :  { %541 = vmatpush.bf16.msrb.mxu2 %v1059_v42  ;;  %503 = vmatmul.bf16.vlgmr.msra.gmra.mxu3 %v148_v46  ;;  %v1068_v42 = vld [vmem:[%s1375_s5] sm:$0xff] }
  0x25   :  { %617 = vmatpush.bf16.msrb.mxu3 %v1067_v3 }
  0x26   :  { %509 = vmatpush.bf16.msrb.mxu0 %v1049_v43  ;;  %v1078_v43 = vld [vmem:[%s1374_s4] ss:$0 sm:$0xff]  ;;  %s1110_s4 = smov [#allocation2]  }
  0x27   :  { %522 = vmatpush.bf16.msrb.mxu1 %v1057_v44  ;;  %s738_s5 = sshll.u32 %s1110_s4, 4  ;;  %s739_s5 = int_to_ptr.vmem [resolvable:$true] %s738_s5 }
  0x28   :  { %700 = vmatpush.bf16.msra.mxu2 %v1075_v15 }
  0x29   :  { %618 = vmatpush.bf16.msrb.mxu3 %v1066_v4 }
  0x2a   :  { %510 = vmatpush.bf16.msrb.mxu0 %v1048_v47 }
  0x2b   :  { %523 = vmatpush.bf16.msrb.mxu1 %v1056_v48 }
  0x2c   :  { %701 = vmatpush.bf16.msra.mxu2 %v1074_v18 }
  0x2d   :  { %619 = vmatpush.bf16.msrb.mxu3 %v1065_v5 }
  0x2e   :  { %511 = vmatpush.bf16.msrb.mxu0 %v1047_v49  ;;  %v1079_v49 = vld [vmem:[%s1376_s6] ss:$0 sm:$0xff]  ;;  %s740_s6 = sshll.u32 %s1377_s7, 4  ;;  %s741_s6 = int_to_ptr.hbm [resolvable:$true] %s740_s6 }
  0x2f   :  { %524 = vmatpush.bf16.msrb.mxu1 %v1055_v50 }
  0x30   :  { %702 = vmatpush.bf16.msra.mxu2 %v1073_v20 }
  0x31   :  { %620 = vmatpush.bf16.msrb.mxu3 %v1064_v6 }
  0x32   :  { %512 = vmatpush.bf16.msrb.mxu0 %v1046_v52 }
  0x33   :  { %525 = vmatpush.bf16.msrb.mxu1 %v1054_v53  ;;  %945 = vmatmul.msk.bf16.vlgmr.msrb.gmra.mxu2 %vm452_vm0, %v151_v57 }
  0x34   :  { %703 = vmatpush.bf16.msra.mxu2 %v1072_v24 }
  0x35   :  { %621 = vmatpush.bf16.msrb.mxu3 %v1063_v7 }
  0x36   :  { %513 = vmatpush.bf16.msrb.mxu0 %v1045_v55 }
  0x37   :  { %526 = vmatpush.bf16.msrb.mxu1 %v1053_v56 }
  0x38   :  { %704 = vmatpush.bf16.msra.mxu2 %v1071_v26 }
  0x39   :  { %622 = vmatpush.bf16.msrb.mxu3 %v1062_v8 }
  0x3a   :  { %514 = vmatpush.bf16.msrb.mxu0 %v1044_v58 }
  0x3b   :  { %527 = vmatpush.bf16.msrb.mxu1 %v1052_v59 }
  0x3c   :  { %705 = vmatpush.bf16.msra.mxu2 %v1070_v29 }
  0x3d   :  { %623 = vmatpush.bf16.msrb.mxu3 %v1061_v9 }
  0x3e   :  { %515 = vmatpush.bf16.msrb.mxu0 %v1043_v63 }
  0x3f   :  { %528 = vmatpush.bf16.msrb.mxu1 %v1051_v0 }
  0x40   :  { %706 = vmatpush.bf16.msra.mxu2 %v1069_v41 }
  0x41   :  { %516 = vmatmul.bf16.vlgmr.msrb.gmra.mxu0 %v149_v1  ;;  %624 = vmatpush.bf16.msrb.mxu3 %v1060_v12 }
  0x42   :  { %529 = vmatmul.bf16.vlgmr.msrb.gmra.mxu1 %v150_v2 }
  0x44   :  { %707 = vmatpush.bf16.msra.mxu2 %v1068_v42 }
  0x9e   :  { %v465_v10 = vpop.f32.mrf.mxu0 }
  0x9f   :  { %v478_v11 = vpop.f32.mrf.mxu1  ;;  %v466_v21 = vadd.f32 %v1077_v19, %v465_v10 }
  0xa1   :  { %v479_v25 = vadd.f32 %v478_v11, %v466_v21 }
  0xa6   :  { %v467_v13 = vpop.f32.mrf.mxu0  ;;  %v491_v16 = vpop.f32.mrf.mxu2 }
  0xa7   :  { %v480_v14 = vpop.f32.mrf.mxu1  ;;  %v504_v17 = vpop.f32.mrf.mxu3  ;;  %v492_v27 = vadd.f32 %v491_v16, %v479_v25 }
  0xa9   :  { %v505_v30 = vadd.f32 %v504_v17, %v492_v27 }
  0xae   :  { %v493_v22 = vpop.f32.mrf.mxu2 }
  0xaf   :  { %v506_v23 = vpop.f32.mrf.mxu3 }
  0xb6   :  { %v543_v28 = vpop.f32.mrf.mxu2 }
  0xbe   :  { %v517_v31 = vpop.f32.mrf.mxu0  ;;  %v545_v35 = vpop.f32.mrf.mxu2 }
  0xbf   :  { %v530_v32 = vpop.f32.mrf.mxu1  ;;  %v518_v33 = vadd.f32 %v517_v31, %v505_v30 }
  0xc1   :  { %v531_v34 = vadd.f32 %v530_v32, %v518_v33 }
  0xc3   :  { %v544_v36 = vadd.f32 %v543_v28, %v531_v34 }
  0xc5   :  { %v547_v37 = vmax.f32 %v544_v36, 0.0 }
  0xc6   :  { %v519_v38 = vpop.f32.mrf.mxu0 }
  0xc7   :  { %v532_v39 = vpop.f32.mrf.mxu1  ;;  %v548_v40 = vpack.c.bf16 %v547_v37, %v547_v37 }
  0xc9   :  { %625 = vmatmul.bf16.vlgmr.msrb.gmra.mxu3 %v548_v40 }
 0x14c   :  { %v626_v44 = vpop.f32.mrf.mxu3 }
 0x14d   :  { %v627_v45 = vadd.f32 %v1078_v43, %v626_v44 }
 0x14f   :  { %v630_v46 = vmax.f32 %v627_v45, 0.0 }
 0x151   :  { %v631_v47 = vpack.c.bf16 %v630_v46, %v630_v46 }
 0x153   :  { %708 = vmatmul.bf16.vlgmr.msra.gmra.mxu2 %v631_v47 }
 0x154   :  { %v628_v48 = vpop.f32.mrf.mxu3 }
 0x1d6   :  { %v709_v50 = vpop.f32.mrf.mxu2 }
 0x1d7   :  { %v710_v51 = vadd.f32 %v1079_v49, %v709_v50 }
 0x1d9   :  { %v1010_v52 = vmul.f32 -1.442695, %v710_v51 }
 0x1db   :  { %1080 = vpow2.f32 %v1010_v52 }
 0x1de   :  { %v711_v53 = vpop.f32.mrf.mxu2 }
 0x1e1   :  { %v1081_v54 = vpop.eup %1080 }
 0x1e2   :  { %v716_v55 = vadd.f32 1.0, %v1081_v54 }
 0x1e4   :  { %1082 = vrcp.f32 %v716_v55  ;;  %v728_v59 = vand.u32 2147483648, %v716_v55  ;;  %v726_v61 = vand.u32 2147483647, %v716_v55  ;;  %vm722_vm2 = vweird.f32 %v716_v55 }
 0x1e6   :  { %v729_v63 = vor.u32 1.1754944e-38, %v728_v59  ;;  %vm727_vm4 = vcmp.eq.f32.partialorder %v726_v61, 8.507059e+37 }
 0x1ea   :  { %v1083_v56 = vpop.eup %1082 }
 0x1eb   :  { %v718_v57 = vmul.f32 %v1083_v56, %v716_v55  ;;  %vm723_vm1 = vweird.f32 %v1083_v56 }
 0x1ec   :  { %vm724_vm3 = vmor %vm722_vm2, %vm723_vm1 }
 0x1ed   :  { %v719_v58 = vsub.f32 1.0, %v718_v57 }
 0x1ef   :  { %v720_v60 = vmul.f32 %v1083_v56, %v719_v58 }
 0x1f1   :  { %v721_v62 = vadd.f32 %v1083_v56, %v720_v60 }
 0x1f3   :  { %v725_v0 = vsel %vm724_vm3, %v1083_v56, %v721_v62 }
 0x1f4   :  { %v730_v1 = vsel %vm727_vm4, %v729_v63, %v725_v0 }
 0x1f5   :  { %732 = vst [vmem:[#allocation2] sm:$0xff] %v730_v1 }
 0x1f6   :  { %743 = dma.vmem_to_hbm [thread:$0]  %s739_s5, 128, %s741_s6, [#allocation3]  }
 0x1f7   :  { %1108 = dma.done.wait [#allocation3], 128  }
 0x1f8   :  { %1109 = vsyncadd [#allocation3], 4294967168 }
 0x1f9   :  { %748 = vsyncpa [#allocation3], 1 }

</bundles_post_ra>
